<compile_context>
chip_gen: v7x
topology: tpu7x:2x2x1
jax: 0.10.0
libtpu: 0.0.40
codegen_flags: <defaults>
</compile_context>

<pallas_src>
import jax
import jax.numpy as jnp
from jax.experimental import pallas as pl
from jax.experimental.pallas import tpu as pltpu


def _round_up(v, m):
    return ((v + m - 1) // m) * m


# ----------------------------- Pallas kernel ---------------------------------

def rgcn_layer_kernel(a_ref, xt_ref, xf_ref, w_ref, root_ref, bias_ref, o_ref):
    """One (row-tile, relation) grid step of a single RGCNConv layer + ReLU.

    a_ref   : (1, TM, N_pad)           bf16  row tile of relation-r adjacency
    xt_ref  : (TM, F_in_pad)           bf16  row tile of x (root term)
    xf_ref  : (N_pad, F_in_pad)        bf16  full x (neighbor agg), VMEM resident
    w_ref   : (1, F_in_pad, F_out_pad) bf16  relation weight W_r
    root_ref: (F_in_pad, F_out_pad)    bf16  root weight
    bias_ref: (1, F_out_pad)           f32
    o_ref   : (TM, F_out_pad)          f32   output tile; doubles as accumulator
    """
    r = pl.program_id(1)

    @pl.when(r == 0)
    def _init():
        # root term + bias initializes the (output-resident) accumulator
        o_ref[...] = (
            jnp.dot(xt_ref[...], root_ref[...],
                    preferred_element_type=jnp.float32)
            + bias_ref[...]
        )

    # mean-aggregated neighbours of relation r for this row tile, then W_r
    h = jnp.dot(a_ref[0], xf_ref[...], preferred_element_type=jnp.float32)
    o_ref[...] += jnp.dot(h.astype(jnp.bfloat16), w_ref[0],
                          preferred_element_type=jnp.float32)

    @pl.when(r == pl.num_programs(1) - 1)
    def _finalize():
        o_ref[...] = jnp.maximum(o_ref[...], 0.0)   # activation = relu


def rgcn_conv_pallas(x_pad, a_pad, w_pad, root_pad, bias_pad, *, tm):
    """One RGCNConv layer + ReLU on padded operands.

    x_pad (N_pad, F_in_pad) bf16, a_pad (R, N_pad, N_pad) bf16,
    w_pad (R, F_in_pad, F_out_pad) bf16, root_pad (F_in_pad, F_out_pad) bf16,
    bias_pad (1, F_out_pad) f32  ->  (N_pad, F_out_pad) f32.
    """
    r_rel, n_pad, _ = a_pad.shape
    f_in_p = x_pad.shape[1]
    f_out_p = root_pad.shape[1]
    num_tiles = n_pad // tm

    # Explicit VMEM budget (bytes): A row tile dominates; inputs double-buffered.
    est = (2 * tm * n_pad * 2              # A row tile (bf16), double buffered
           + 2 * tm * f_in_p * 2           # x row tile (bf16)
           + 2 * n_pad * f_in_p * 2        # resident full x (conservative 2 bufs)
           + 2 * 2 * f_in_p * f_out_p * 2  # W_r + W_root (bf16)
           + 2 * f_out_p * 4               # bias
           + 2 * tm * f_out_p * 4)         # output tile (also the accumulator)
    vmem_limit = int(min(max(2 * est, 32 * 1024 * 1024), 64 * 1024 * 1024))

    return pl.pallas_call(
        rgcn_layer_kernel,
        out_shape=jax.ShapeDtypeStruct((n_pad, f_out_p), jnp.float32),
        grid_spec=pltpu.PrefetchScalarGridSpec(
            num_scalar_prefetch=0,
            grid=(num_tiles, r_rel),        # relations innermost (reduction)
            in_specs=[
                pl.BlockSpec((1, tm, n_pad), lambda i, r: (r, i, 0)),
                pl.BlockSpec((tm, f_in_p), lambda i, r: (i, 0)),
                pl.BlockSpec((n_pad, f_in_p), lambda i, r: (0, 0)),
                pl.BlockSpec((1, f_in_p, f_out_p), lambda i, r: (r, 0, 0)),
                pl.BlockSpec((f_in_p, f_out_p), lambda i, r: (0, 0)),
                pl.BlockSpec((1, f_out_p), lambda i, r: (0, 0)),
            ],
            out_specs=pl.BlockSpec((tm, f_out_p), lambda i, r: (i, 0)),
        ),
        compiler_params=pltpu.CompilerParams(
            dimension_semantics=("parallel", "arbitrary"),
            vmem_limit_bytes=vmem_limit,
        ),
    )(a_pad, x_pad, x_pad, w_pad, root_pad, bias_pad)


# ------------------------------- glue (JAX) -----------------------------------

def build_relation_adjacency(edge_index, edge_type, num_relations, n_pad):
    """Dense row-normalized A[r, i, j] = (#edges j->i of type r) / deg_r(i),
    zero-padded to (R, n_pad, n_pad) and cast to bf16 (built once, reused by
    every layer).
    # TODO(synk): replace dense A with a scalar-prefetch / block-sparse CSR
    # formulation to skip empty (relation, row-tile) pairs on large graphs.
    """
    src = edge_index[0]
    dst = edge_index[1]
    counts = jnp.zeros((num_relations, n_pad, n_pad), jnp.float32)
    counts = counts.at[edge_type, dst, src].add(1.0)
    deg = counts.sum(axis=2, keepdims=True)
    a = counts / jnp.where(deg > 0.0, deg, 1.0)
    return a.astype(jnp.bfloat16)


class RGCNModulePallas:
    """Parameters + forward for RGCNModule with fast=False, num_bases=1,
    n2_edge_types=True, full_receptive_field=True, activation='relu'."""

    def __init__(self, key, input_size, hidden_sizes, num_node_types,
                 agent_node_types, num_bases=1, tm=128):
        self.num_node_types = num_node_types
        self.agent_node_types = jnp.asarray(agent_node_types, jnp.int32)
        # n2_edge_types=True (matches the PyTorch module; as in the original,
        # edge types can exceed this if a non-agent node is ever a destination)
        self.num_relations = len(agent_node_types) * num_node_types
        self.tm = tm
        sizes = [input_size] + list(hidden_sizes)
        self.f_in_pad0 = _round_up(sizes[0], 128)
        self.params = []
        for i in range(len(sizes) - 1):
            f_in, f_out = sizes[i], sizes[i + 1]
            f_in_p, f_out_p = _round_up(f_in, 128), _round_up(f_out, 128)
            key, k1, k2, k3 = jax.random.split(key, 4)
            # basis decomposition: W_r = sum_b comp[r, b] * basis[b]
            basis = jax.random.normal(k1, (num_bases, f_in, f_out), jnp.float32) * 0.1
            comp = jax.random.normal(k2, (self.num_relations, num_bases), jnp.float32)
            root = jax.random.normal(k3, (f_in, f_out), jnp.float32) * 0.1
            bias = jnp.zeros((f_out,), jnp.float32)
            weight = jnp.einsum("rb,bio->rio", comp, basis)
            # pad feature dims to lane-dense multiples of 128; bf16 matmul operands
            w_pad = jnp.pad(weight, ((0, 0), (0, f_in_p - f_in),
                                     (0, f_out_p - f_out))).astype(jnp.bfloat16)
            root_pad = jnp.pad(root, ((0, f_in_p - f_in),
                                      (0, f_out_p - f_out))).astype(jnp.bfloat16)
            bias_pad = jnp.pad(bias, (0, f_out_p - f_out)).reshape(1, f_out_p)
            self.params.append((w_pad, root_pad, bias_pad, f_out))

    def __call__(self, x, edge_index, node_type):
        n = x.shape[0]
        # edge-type generation (n2_edge_types=True)
        edge_type = (node_type[edge_index[1]] * self.num_node_types
                     + node_type[edge_index[0]]).astype(jnp.int32)
        # agent-node gather; data-dependent shape -> eager only
        # (under jit, pass precomputed static agent indices instead)
        agent_idx = jnp.flatnonzero(jnp.isin(node_type, self.agent_node_types))
        n_pad = _round_up(n, self.tm)
        a_pad = build_relation_adjacency(edge_index, edge_type,
                                         self.num_relations, n_pad)
        xk = jnp.pad(x, ((0, n_pad - n), (0, self.f_in_pad0 - x.shape[1])))
        xk = xk.astype(jnp.bfloat16)
        outs = []
        for (w_pad, root_pad, bias_pad, f_out) in self.params:
            y = rgcn_conv_pallas(xk, a_pad, w_pad, root_pad, bias_pad, tm=self.tm)
            outs.append(y[agent_idx, :f_out])        # x[agent_nodes]
            # padded feature columns of y are exactly zero, so the padded
            # activation can be fed straight into the next layer
            xk = y.astype(jnp.bfloat16)
        return jnp.concatenate(outs, axis=1)         # full_receptive_field


# -------------------------- pure-JAX reference check ---------------------------

def _reference_forward(module, x, edge_index, node_type):
    """Dense pure-JAX reference mirroring the kernel's bf16-operand / f32-acc math."""
    n = x.shape[0]
    edge_type = (node_type[edge_index[1]] * module.num_node_types
                 + node_type[edge_index[0]]).astype(jnp.int32)
    agent_idx = jnp.flatnonzero(jnp.isin(node_type, module.agent_node_types))
    n_pad = _round_up(n, module.tm)
    a = build_relation_adjacency(edge_index, edge_type, module.num_relations, n_pad)
    xk = jnp.pad(x, ((0, n_pad - n), (0, module.f_in_pad0 - x.shape[1])))
    xk = xk.astype(jnp.bfloat16)
    outs = []
    for (w_pad, root_pad, bias_pad, f_out) in module.params:
        out = jnp.dot(xk, root_pad, preferred_element_type=jnp.float32) + bias_pad
        h = jnp.einsum("rij,jf->rif", a, xk, preferred_element_type=jnp.float32)
        out = out + jnp.einsum("rif,rfo->io", h.astype(jnp.bfloat16), w_pad,
                               preferred_element_type=jnp.float32)
        y = jnp.maximum(out, 0.0)
        outs.append(y[agent_idx, :f_out])
        xk = y.astype(jnp.bfloat16)
    return jnp.concatenate(outs, axis=1)


if __name__ == "__main__":
    key = jax.random.PRNGKey(0)

    # small, deterministic synthetic problem
    n_nodes = 12
    n_edges = 32
    input_size = 16
    hidden_sizes = [32, 48]
    num_node_types = 3
    agent_node_types = [0, 1]

    # node types laid out so agent / non-agent nodes are interleaved
    node_type = jnp.array([0, 1, 2, 0, 1, 2, 0, 1, 2, 0, 1, 2], jnp.int32)
    agent_nodes = jnp.array([0, 1, 3, 4, 6, 7, 9, 10], jnp.int32)

    key, ks, kd, kx = jax.random.split(key, 4)
    src = jax.random.randint(ks, (n_edges,), 0, n_nodes, jnp.int32)
    # destinations are agent nodes (messages flow towards agents), which keeps
    # edge_type < len(agent_node_types) * num_node_types as the module assumes
    dst = agent_nodes[jax.random.randint(kd, (n_edges,), 0,
                                         agent_nodes.shape[0], jnp.int32)]
    edge_index = jnp.stack([src, dst], axis=0)
    x = jax.random.normal(kx, (n_nodes, input_size), jnp.float32)

    key, kparams = jax.random.split(key)
    module = RGCNModulePallas(kparams, input_size, hidden_sizes,
                              num_node_types, agent_node_types,
                              num_bases=1, tm=128)

    out = module(x, edge_index, node_type)
    out = jax.block_until_ready(out)

    ref = _reference_forward(module, x, edge_index, node_type)
    ref = jax.block_until_ready(ref)

    assert out.shape == (int(agent_nodes.shape[0]), sum(hidden_sizes)), out.shape
    max_err = float(jnp.max(jnp.abs(out - ref)))
    assert max_err < 2e-2, max_err

    print("KERNEL_OK")
</pallas_src>

<mosaic_0001>
module attributes {stable_mosaic.version = 11 : i64} {
  func.func @rgcn_layer_kernel(%arg0: i32, %arg1: i32, %arg2: memref<1x128x128xbf16, #tpu.memory_space<vmem>>, %arg3: memref<128x128xbf16, #tpu.memory_space<vmem>>, %arg4: memref<128x128xbf16, #tpu.memory_space<vmem>>, %arg5: memref<1x128x128xbf16, #tpu.memory_space<vmem>>, %arg6: memref<128x128xbf16, #tpu.memory_space<vmem>>, %arg7: memref<1x128xf32, #tpu.memory_space<vmem>>, %arg8: memref<128x128xf32, #tpu.memory_space<vmem>>) attributes {dimension_semantics = [#tpu.dimension_semantics<parallel>, #tpu.dimension_semantics<arbitrary>], iteration_bounds = array<i64: 1, 6>, scalar_prefetch = 0 : i64, scratch_operands = 0 : i64, tpu.core_type = #tpu.core_type<tc>, window_params = [{transform_indices = @transform_0, window_bounds = array<i64: 1, 128, 128>}, {transform_indices = @transform_1, window_bounds = array<i64: 128, 128>}, {pipeline_mode = #tpu.pipeline_mode<synchronous>, transform_indices = @transform_2, window_bounds = array<i64: 128, 128>}, {transform_indices = @transform_3, window_bounds = array<i64: 1, 128, 128>}, {pipeline_mode = #tpu.pipeline_mode<synchronous>, transform_indices = @transform_4, window_bounds = array<i64: 128, 128>}, {pipeline_mode = #tpu.pipeline_mode<synchronous>, transform_indices = @transform_5, window_bounds = array<i64: 1, 128>}, {transform_indices = @transform_6, window_bounds = array<i64: 128, 128>}]} {
    %c0_i32 = arith.constant 0 : i32
    %0 = arith.cmpi eq, %arg1, %c0_i32 : i32
    %1 = arith.extui %0 : i1 to i32
    %c0_i32_0 = arith.constant 0 : i32
    %2 = arith.cmpi ne, %1, %c0_i32_0 : i32
    scf.if %2 {
      %c0_14 = arith.constant 0 : index
      %c0_15 = arith.constant 0 : index
      %17 = vector.load %arg3[%c0_14, %c0_15] : memref<128x128xbf16, #tpu.memory_space<vmem>>, vector<128x128xbf16>
      %c0_16 = arith.constant 0 : index
      %c0_17 = arith.constant 0 : index
      %18 = vector.load %arg6[%c0_16, %c0_17] : memref<128x128xbf16, #tpu.memory_space<vmem>>, vector<128x128xbf16>
      %cst_18 = arith.constant dense<0.000000e+00> : vector<128x128xf32>
      %19 = tpu.matmul %17, %18, %cst_18 {dimension_numbers = #tpu.dot_dimension_numbers<[1], [0], [0], [1], [0, 0, 1, 1], [], []>} : vector<128x128xbf16>, vector<128x128xbf16>, vector<128x128xf32> -> vector<128x128xf32>
      %c0_19 = arith.constant 0 : index
      %c0_20 = arith.constant 0 : index
      %20 = vector.load %arg7[%c0_19, %c0_20] : memref<1x128xf32, #tpu.memory_space<vmem>>, vector<1x128xf32>
      %21 = vector.broadcast %20 : vector<1x128xf32> to vector<128x128xf32>
      %22 = arith.addf %19, %21 : vector<128x128xf32>
      %c0_21 = arith.constant 0 : index
      %c0_22 = arith.constant 0 : index
      %23 = vector.load %arg8[%c0_21, %c0_22] : memref<128x128xf32, #tpu.memory_space<vmem>>, vector<128x128xf32>
      tpu.vector_store %arg8[%c0_21, %c0_22], %22 {strides = array<i32>} : memref<128x128xf32, #tpu.memory_space<vmem>>, vector<128x128xf32>,
    } else {
    }
    %c0 = arith.constant 0 : index
    %c0_1 = arith.constant 0 : index
    %c0_2 = arith.constant 0 : index
    %3 = vector.load %arg2[%c0, %c0_1, %c0_2] : memref<1x128x128xbf16, #tpu.memory_space<vmem>>, vector<1x128x128xbf16>
    %4 = vector.shape_cast %3 : vector<1x128x128xbf16> to vector<128x128xbf16>
    %c0_3 = arith.constant 0 : index
    %c0_4 = arith.constant 0 : index
    %5 = vector.load %arg4[%c0_3, %c0_4] : memref<128x128xbf16, #tpu.memory_space<vmem>>, vector<128x128xbf16>
    %cst = arith.constant dense<0.000000e+00> : vector<128x128xf32>
    %6 = tpu.matmul %4, %5, %cst {dimension_numbers = #tpu.dot_dimension_numbers<[1], [0], [0], [1], [0, 0, 1, 1], [], []>} : vector<128x128xbf16>, vector<128x128xbf16>, vector<128x128xf32> -> vector<128x128xf32>
    %c0_5 = arith.constant 0 : index
    %c0_6 = arith.constant 0 : index
    %7 = vector.load %arg8[%c0_5, %c0_6] : memref<128x128xf32, #tpu.memory_space<vmem>>, vector<128x128xf32>
    %8 = arith.truncf %6 : vector<128x128xf32> to vector<128x128xbf16>
    %c0_7 = arith.constant 0 : index
    %c0_8 = arith.constant 0 : index
    %c0_9 = arith.constant 0 : index
    %9 = vector.load %arg5[%c0_7, %c0_8, %c0_9] : memref<1x128x128xbf16, #tpu.memory_space<vmem>>, vector<1x128x128xbf16>
    %10 = vector.shape_cast %9 : vector<1x128x128xbf16> to vector<128x128xbf16>
    %cst_10 = arith.constant dense<0.000000e+00> : vector<128x128xf32>
    %11 = tpu.matmul %8, %10, %cst_10 {dimension_numbers = #tpu.dot_dimension_numbers<[1], [0], [0], [1], [0, 0, 1, 1], [], []>} : vector<128x128xbf16>, vector<128x128xbf16>, vector<128x128xf32> -> vector<128x128xf32>
    %12 = arith.addf %7, %11 : vector<128x128xf32>
    %c0_11 = arith.constant 0 : index
    %c0_12 = arith.constant 0 : index
    %13 = vector.load %arg8[%c0_11, %c0_12] : memref<128x128xf32, #tpu.memory_space<vmem>>, vector<128x128xf32>
    tpu.vector_store %arg8[%c0_11, %c0_12], %12 {strides = array<i32>} : memref<128x128xf32, #tpu.memory_space<vmem>>, vector<128x128xf32>,
    %c5_i32 = arith.constant 5 : i32
    %14 = arith.cmpi eq, %arg1, %c5_i32 : i32
    %15 = arith.extui %14 : i1 to i32
    %c0_i32_13 = arith.constant 0 : i32
    %16 = arith.cmpi ne, %15, %c0_i32_13 : i32
    scf.if %16 {
      %c0_14 = arith.constant 0 : index
      %c0_15 = arith.constant 0 : index
      %17 = vector.load %arg8[%c0_14, %c0_15] : memref<128x128xf32, #tpu.memory_space<vmem>>, vector<128x128xf32>
      %cst_16 = arith.constant 0.000000e+00 : f32
      %18 = vector.broadcast %cst_16 : f32 to vector<128x128xf32>
      %19 = arith.maximumf %17, %18 : vector<128x128xf32>
      %c0_17 = arith.constant 0 : index
      %c0_18 = arith.constant 0 : index
      %20 = vector.load %arg8[%c0_17, %c0_18] : memref<128x128xf32, #tpu.memory_space<vmem>>, vector<128x128xf32>
      tpu.vector_store %arg8[%c0_17, %c0_18], %19 {strides = array<i32>} : memref<128x128xf32, #tpu.memory_space<vmem>>, vector<128x128xf32>,
    } else {
    }
    return
  }
  func.func @transform_0(%arg0: i32, %arg1: i32) -> (i32, i32, i32) {
    %c0_i32 = arith.constant 0 : i32
    %c0_i32_0 = arith.constant 0 : i32
    return %arg1, %arg0, %c0_i32 : i32, i32, i32
  }
  func.func @transform_1(%arg0: i32, %arg1: i32) -> (i32, i32) {
    %c0_i32 = arith.constant 0 : i32
    %c0_i32_0 = arith.constant 0 : i32
    return %arg0, %c0_i32 : i32, i32
  }
  func.func @transform_2(%arg0: i32, %arg1: i32) -> (i32, i32) {
    %c0_i32 = arith.constant 0 : i32
    %c0_i32_0 = arith.constant 0 : i32
    %c0_i32_1 = arith.constant 0 : i32
    return %c0_i32, %c0_i32_0 : i32, i32
  }
  func.func @transform_3(%arg0: i32, %arg1: i32) -> (i32, i32, i32) {
    %c0_i32 = arith.constant 0 : i32
    %c0_i32_0 = arith.constant 0 : i32
    %c0_i32_1 = arith.constant 0 : i32
    return %arg1, %c0_i32, %c0_i32_0 : i32, i32, i32
  }
  func.func @transform_4(%arg0: i32, %arg1: i32) -> (i32, i32) {
    %c0_i32 = arith.constant 0 : i32
    %c0_i32_0 = arith.constant 0 : i32
    %c0_i32_1 = arith.constant 0 : i32
    return %c0_i32, %c0_i32_0 : i32, i32
  }
  func.func @transform_5(%arg0: i32, %arg1: i32) -> (i32, i32) {
    %c0_i32 = arith.constant 0 : i32
    %c0_i32_0 = arith.constant 0 : i32
    %c0_i32_1 = arith.constant 0 : i32
    return %c0_i32, %c0_i32_0 : i32, i32
  }
  func.func @transform_6(%arg0: i32, %arg1: i32) -> (i32, i32) {
    %c0_i32 = arith.constant 0 : i32
    %c0_i32_0 = arith.constant 0 : i32
    return %arg0, %c0_i32 : i32, i32
  }
}

</mosaic_0001>

<bundles_post_ra>
// kernel: tpu_custom_call.1
= control target key start
LH: loop header
LB: loop body
LE: loop exit
PB: predicated region body
PF: predicated region fallthrough
CT: control target
= control target key end

     0   :  { %s2222_s0 = inlined_call_operand.hbm [shape: bf16[6,128,128], index: 0, kind: input, shape index: {}]   ;;  %s2223_s1 = inlined_call_operand.hbm [shape: bf16[128,128], index: 1, kind: input, shape index: {}]   ;;  %s2224_s2 = inlined_call_operand.hbm [shape: bf16[128,128], index: 2, kind: input, shape index: {}]   ;;  %s2225_s3 = inlined_call_operand.hbm [shape: bf16[6,128,128], index: 3, kind: input, shape index: {}]   ;;  %s2226_s4 = inlined_call_operand.hbm [shape: bf16[128,128], index: 4, kind: input, shape index: {}]   ;;  %s2227_s5 = inlined_call_operand.vmem [shape: f32[1,128], index: 5, kind: input, shape index: {}]   ;;  %s2228_s6 = inlined_call_operand.hbm [shape: f32[128,128], index: 6, kind: output, shape index: {}]  }
   0x1   :  { %2236 = sst [smem:[#allocation17_spill]] %s2222_s0 }
   0x2   :  { %2237 = sst [smem:[#allocation18_spill]] %s2223_s1 }
   0x3   :  { %11 = vsyncpa [#allocation3], 0 }
   0x4   :  { %13 = vsyncpa [#allocation3 + $0x1], 0 }
   0x5   :  { %14 = vsyncpa [#allocation6], 0 }
   0x6   :  { %15 = vsyncpa [#allocation9], 0 }
   0x7   :  { %17 = vsyncpa [#allocation9 + $0x1], 0 }
   0x8   :  { %18 = vsyncpa [#allocation4], 0  ;;  %s1901_s21 = smov 0   ;;  %s1903_s22 = smov 0  }
   0x9   :  { %s1905_s23 = smov 0   ;;  %s1907_s24 = smov 0  }
   0xa   :  { %s1909_s25 = smov 0   ;;  %s1911_s26 = smov 0  }
   0xb LB: > { %s1930_s27 = sadd.s32 4294967295, %s1854_s26   ;;  %p58_p0 = scmp.ne.s32.totalorder %s1838_s22, %s1834_s21  ;;  %s1854_s26 = sphi %s1911_s26, %s24_s26   ;;  %s1850_s25 = sphi %s1909_s25, %s2257_s25   ;;  %s1846_s24 = sphi %s1907_s24, %s2256_s24   ;;  %s1842_s23 = sphi %s1905_s23, %s2255_s23   ;;  %s1838_s22 = sphi %s1903_s22, %s2254_s22   ;;  %s1834_s21 = sphi %s1901_s21, %s2253_s21  }
   0xc   : > { %p2229_p1 = scmp.eq.s32.totalorder %s1930_s27, 0  ;;  %p1250_p2 = scmp.ge.s32.totalorder %s1854_s26, 1 }
   0xd   : > { %p210_p3 = scmp.lt.s32.totalorder %s1854_s26, 7  ;;  %s1856_s30 = smov [#allocation5]  }
   0xe   : > { %p1938_p4 = por %p2229_p1, %p58_p0  ;;  %s225_s7 = sshll.u32 %s1856_s30, 4  ;;  %s1946_s7 = int_to_ptr.vmem [resolvable:$true] %s225_s7 }
   0xf   : > { %p1942_p5 = pnand %p1250_p2, %p210_p3  ;;  %s1857_s9 = smov [#allocation10]  }
  0x10   : > { %s2238_s28 = scalar_select %p1938_p4, 1, 0 }
  0x11   : > { %s2239_s29 = scalar_select %p1942_p5, 1, 0 }
  0x12   : > { %p1496_p6 = pneg %p1942_p5  ;;  %s251_s10 = sshll.u32 %s1857_s9, 4  ;;  %s1956_s10 = int_to_ptr.vmem [resolvable:$true] %s251_s10 }
  0x13   : > { %s1858_s11 = smov [#allocation7]   ;;  %s2241_s1 = sld [smem:[#allocation18_spill]] }
  0x14   : > { %p1952_p7 = pnand %p1496_p6, %p2229_p1  ;;  %s1958_s12 = sshll.u32 %s1858_s11, 4  ;;  %s239_s12 = int_to_ptr.vmem [resolvable:$true] %s1958_s12 }
  0x16   : > { %p1968_p9 = pneg %p1952_p7 }
  0x19   : > { %s1618_s15 = scalar_lea.hbm %s2241_s1, 1024 }
  0x1a   : > { %p1619_p8 = scmp.ne.s32.totalorder %s2241_s1, %s1618_s15  ;;  %p1625_p12 = scmp.lt.u32.totalorder %s1618_s15, %s2241_s1 }
  0x1c   : > { %p1621_p10 = pnand %p1968_p9, %p1619_p8 }
  0x1e   : > { %p1622_p11 = pneg %p1621_p10 }
  0x20   : > { %p1627_p13 = pnand %p1625_p12, %p1622_p11 }
  0x22   : > { %1630 = shalt.err (!%p1627_p13)
}
  0x23   : > { %s1631_s21 = scalar_lea.vmem %s1946_s7, 1024  ;;  %p1639_p6 = scmp.lt.s32.totalorder %s1946_s7, %s1946_s7 }
  0x24   : > { %p1632_p0 = scmp.ne.s32.totalorder %s1946_s7, %s1631_s21  ;;  %p1640_p1 = scmp.lt.s32.totalorder %s1631_s21, %s1631_s21 }
  0x26   : > { %p1634_p2 = pnand %p1632_p0, %p1968_p9  ;;  %p1641_p8 = por %p1640_p1, %p1639_p6 }
  0x28   : > { %p1635_p3 = pneg %p1634_p2 }
  0x2a   : > { %p1642_p10 = pnand %p1641_p8, %p1635_p3 }
  0x2c   : > { %1645 = shalt.err (!%p1642_p10)
}
  0x2d   : > { %s2232_s30 = smov 64   ;;  %s2234_s9 = smov 4  }
  0x2e   : > { %1499 = dma.hbm_to_vmem [thread:$0]  (!%p1952_p7), %s2241_s1, 1024, %s1946_s7, [#allocation6], %s2232_s30, %s2232_s30, %s2234_s9  }
  0x2f   : > { %s1646_s16 = scalar_lea.hbm %s2226_s4, 1024 }
  0x30   : > { %p1647_p1 = scmp.ne.s32.totalorder %s2226_s4, %s1646_s16  ;;  %p1653_p13 = scmp.lt.u32.totalorder %s1646_s16, %s2226_s4 }
  0x32   : > { %p1649_p11 = pnand %p1647_p1, %p1968_p9 }
  0x34   : > { %p1650_p12 = pneg %p1649_p11 }
  0x36   : > { %p1655_p0 = pnand %p1653_p13, %p1650_p12 }
  0x38   : > { %1658 = shalt.err (!%p1655_p0)
}
  0x39   : > { %s1659_s7 = scalar_lea.vmem %s1956_s10, 1024  ;;  %p1667_p8 = scmp.lt.s32.totalorder %s1956_s10, %s1956_s10 }
  0x3a   : > { %p1660_p2 = scmp.ne.s32.totalorder %s1956_s10, %s1659_s7  ;;  %p1668_p10 = scmp.lt.s32.totalorder %s1659_s7, %s1659_s7 }
  0x3c   : > { %p1662_p3 = pnand %p1660_p2, %p1968_p9  ;;  %p1669_p1 = por %p1668_p10, %p1667_p8 }
  0x3e   : > { %p1663_p6 = pneg %p1662_p3 }
  0x40   : > { %p1670_p11 = pnand %p1669_p1, %p1663_p6 }
  0x42   : > { %1673 = shalt.err (!%p1670_p11)
}
  0x43   : > { %1505 = dma.hbm_to_vmem [thread:$0]  (!%p1952_p7), %s2226_s4, 1024, %s1956_s10, [#allocation9], %s2232_s30, %s2232_s30, %s2234_s9  }
  0x44   : > { %s1674_s16 = scalar_lea.hbm %s2224_s2, 1024 }
  0x45   : > { %p1675_p12 = scmp.ne.s32.totalorder %s2224_s2, %s1674_s16  ;;  %p1681_p2 = scmp.lt.u32.totalorder %s1674_s16, %s2224_s2 }
  0x47   : > { %p1677_p13 = pnand %p1675_p12, %p1968_p9 }
  0x49   : > { %p1678_p0 = pneg %p1677_p13 }
  0x4b   : > { %p1683_p3 = pnand %p1681_p2, %p1678_p0 }
  0x4d   : > { %1686 = shalt.err (!%p1683_p3)
}
  0x4e   : > { %s1687_s7 = scalar_lea.vmem %s239_s12, 1024  ;;  %p1695_p1 = scmp.lt.s32.totalorder %s239_s12, %s239_s12 }
  0x4f   : > { %p1688_p6 = scmp.ne.s32.totalorder %s239_s12, %s1687_s7  ;;  %p1696_p11 = scmp.lt.s32.totalorder %s1687_s7, %s1687_s7 }
  0x51   : > { %p1690_p8 = pnand %p1688_p6, %p1968_p9  ;;  %p1697_p4 = por %p1696_p11, %p1695_p1 }
  0x53   : > { %p1691_p10 = pneg %p1690_p8 }
  0x55   : > { %p1698_p5 = pnand %p1697_p4, %p1691_p10 }
  0x57   : > { %1701 = shalt.err (!%p1698_p5)
}
  0x58   : > { %1502 = dma.hbm_to_vmem [thread:$0]  (!%p1952_p7), %s2224_s2, 1024, %s239_s12, [#allocation6], %s2232_s30, %s2232_s30, %s2234_s9  }
  0x59   : > { %s45_s18 = sadd.s32 1, %s1842_s23  ;;  %s33_s13 = sadd.s32 1, %s1850_s25 }
  0x5a   : > { %p52_p4 = scmp.ne.s32.totalorder %s1842_s23, %s1838_s22  ;;  %p34_p5 = scmp.ge.s32.totalorder %s33_s13, 6 }
  0x5b   : > { %p53_p9 = scmp.eq.s32.totalorder %s1854_s26, 0  ;;  %p1516_p12 = scmp.lt.s32.totalorder %s1854_s26, 6 }
  0x5c   : > { %s268_s8 = sand.u32 1, %s1842_s23   ;;  %s2259_s13 = smov (%p34_p5, %s33_s13), 0 }
  0x5d   : > { %p54_p13 = por %p53_p9, %p52_p4  ;;  %s40_s14 = ssub.s32 %s1850_s25, %s2259_s13 }
  0x5e   : > { %s1255_s15 = sshll.u32 %s268_s8, 6  ;;  %p43_p0 = scmp.eq.s32.totalorder %s40_s14, 0 }
  0x5f   : > { %s1314_s16 = sshll.u32 %s1850_s25, 10  ;;  %s272_s17 = scalar_lea.vmem [#allocation2], %s1255_s15 }
  0x60   : > { %s281_s19 = sshll.u32 %s272_s17, 4  ;;  %s2243_s0 = sld [smem:[#allocation17_spill]]  ;;  %s2060_s19 = int_to_ptr.vmem [resolvable:$true] %s281_s19 }
  0x61   : > { %s2053_s12 = scalar_select %p43_p0, %s1842_s23, %s45_s18  }
  0x62   : > { %p2064_p7 = pnand %p1516_p12, %p54_p13  ;;  %s2071_s18 = scalar_lea.hbm %s2225_s3, %s1314_s16 }
  0x63   : > { %s295_s17 = scalar_lea.vmem [#allocation8], %s1255_s15  ;;  %s2075_s21 = scalar_lea.sflag [#allocation3], %s268_s8 }
  0x64   : > { %s302_s20 = sshll.u32 %s295_s17, 4  ;;  %p1704_p3 = pneg %p2064_p7  ;;  %s2073_s20 = int_to_ptr.vmem [resolvable:$true] %s302_s20 }
  0x66   : > { %s2058_s7 = scalar_lea.hbm %s2243_s0, %s1314_s16  ;;  %s1707_s14 = scalar_lea.hbm %s2243_s0, 6144 }
  0x67   : > { %s1702_s30 = scalar_lea.hbm %s2058_s7, 1024  ;;  %p1708_p10 = scmp.lt.u32.totalorder %s2058_s7, %s2243_s0 }
  0x68   : > { %p1703_p2 = scmp.ne.s32.totalorder %s2058_s7, %s1702_s30  ;;  %p1709_p1 = scmp.lt.u32.totalorder %s1707_s14, %s1702_s30 }
  0x69   : > { %p1711_p4 = scmp.lt.u32.totalorder %s1702_s30, %s2058_s7 }
  0x6a   : > { %p1705_p6 = pnand %p1704_p3, %p1703_p2  ;;  %p1710_p11 = por %p1709_p1, %p1708_p10 }
  0x6c   : > { %p1706_p8 = pneg %p1705_p6  ;;  %p1712_p5 = por %p1711_p4, %p1710_p11 }
  0x6e   : > { %p1713_p9 = pnand %p1712_p5, %p1706_p8 }
  0x70   : > { %1716 = shalt.err (!%p1713_p9)
}
  0x71   : > { %s1717_s8 = scalar_lea.vmem %s2060_s19, 1024  ;;  %s1861_s9 = smov [#allocation2]  }
  0x72   : > { %p1718_p12 = scmp.ne.s32.totalorder %s2060_s19, %s1717_s8  ;;  %s1722_s15 = sshll.u32 %s1861_s9, 4  ;;  %s1723_s15 = int_to_ptr.vmem [resolvable:$false] %s1722_s15 }
  0x73   : > { %s1724_s1 = scalar_lea.vmem %s1723_s15, 2048  ;;  %p1725_p2 = scmp.lt.s32.totalorder %s2060_s19, %s1723_s15 }
  0x74   : > { %p1720_p13 = pnand %p1718_p12, %p1704_p3  ;;  %p1726_p6 = scmp.lt.s32.totalorder %s1724_s1, %s1717_s8 }
  0x76   : > { %p1721_p0 = pneg %p1720_p13  ;;  %p1727_p10 = por %p1726_p6, %p1725_p2 }
  0x78   : > { %p1728_p1 = pnand %p1727_p10, %p1721_p0 }
  0x7a   : > { %1731 = shalt.err (!%p1728_p1)
}
  0x7b   : > { %s2245_s30 = smov 4   ;;  %s2246_s17 = smov 64  }
  0x7c   : > { %1509 = dma.hbm_to_vmem [thread:$0]  (!%p2064_p7), %s2058_s7, 1024, %s2060_s19, %s2075_s21, %s2246_s17, %s2246_s17, %s2245_s30  }
  0x7d   : > { %s291_s11 = sand.u32 1, %s1854_s26   ;;  %s1732_s16 = scalar_lea.hbm %s2071_s18, 1024 }
  0x7e   : > { %s2107_s14 = scalar_lea.sflag [#allocation9], %s291_s11  ;;  %p1733_p8 = scmp.ne.s32.totalorder %s2071_s18, %s1732_s16 }
  0x7f   : > { %s1737_s15 = scalar_lea.hbm %s2225_s3, 6144  ;;  %p1738_p5 = scmp.lt.u32.totalorder %s2071_s18, %s2225_s3 }
  0x80   : > { %p1735_p11 = pnand %p1733_p8, %p1704_p3  ;;  %p1739_p9 = scmp.lt.u32.totalorder %s1737_s15, %s1732_s16 }
  0x81   : > { %p1741_p13 = scmp.lt.u32.totalorder %s1732_s16, %s2071_s18 }
  0x82   : > { %p1736_p4 = pneg %p1735_p11  ;;  %p1740_p12 = por %p1739_p9, %p1738_p5 }
  0x84   : > { %p1742_p0 = por %p1741_p13, %p1740_p12 }
  0x86   : > { %p1743_p2 = pnand %p1742_p0, %p1736_p4 }
  0x88   : > { %1746 = shalt.err (!%p1743_p2)
}
  0x89   : > { %s1747_s19 = scalar_lea.vmem %s2073_s20, 1024  ;;  %s1862_s7 = smov [#allocation8]  }
  0x8a   : > { %p1748_p6 = scmp.ne.s32.totalorder %s2073_s20, %s1747_s19  ;;  %s1752_s21 = sshll.u32 %s1862_s7, 4  ;;  %s1753_s21 = int_to_ptr.vmem [resolvable:$false] %s1752_s21 }
  0x8b   : > { %s1754_s0 = scalar_lea.vmem %s1753_s21, 2048  ;;  %p1755_p8 = scmp.lt.s32.totalorder %s2073_s20, %s1753_s21 }
  0x8c   : > { %p1750_p10 = pnand %p1748_p6, %p1704_p3  ;;  %p1756_p11 = scmp.lt.s32.totalorder %s1754_s0, %s1747_s19 }
  0x8e   : > { %p1751_p1 = pneg %p1750_p10  ;;  %p1757_p5 = por %p1756_p11, %p1755_p8 }
  0x90   : > { %p1758_p9 = pnand %p1757_p5, %p1751_p1 }
  0x92   : > { %1761 = shalt.err (!%p1758_p9)
}
  0x93   : > { %1512 = dma.hbm_to_vmem [thread:$0]  (!%p2064_p7), %s2071_s18, 1024, %s2073_s20, %s2107_s14, %s2246_s17, %s2246_s17, %s2245_s30  }
  0x94   : > { %p2247_p3 = scmp.ne.s32.totalorder %s2239_s29, 0 }
  0x95   : > { %s316_s11 = sand.u32 (!%p2247_p3), 1, %s1838_s22   ;;  %p2248_p4 = scmp.ne.s32.totalorder (!%p2247_p3), %s2238_s28, 0 }
  0x96   : > { %314 = sbr.rel (%p2247_p3) target bundleno = 956 (0x3bc), region = 44  ;;  %s1262_s16 = sshll.u32 (!%p2247_p3), %s316_s11, 6 }
  0x97   : > { %s317_s8 = scalar_lea.sflag (!%p2247_p3), [#allocation3], %s316_s11  ;;  %s2139_s9 = scalar_lea.vmem (!%p2247_p3), [#allocation2], %s1262_s16 }
  0x9d   : > { %1813 = dma.done.wait (%p2248_p4), %s317_s8, 1024  }
  0x9e   : > { %1815 = vsyncadd (%p2248_p4), %s317_s8, 4294966272  ;;  %p2249_p12 = scmp.eq.s32.totalorder %s1930_s27, 0 }
  0xa0   : > { %1817 = dma.done.wait (%p2249_p12), [#allocation6], 2048   ;;  %p2250_p7 = pmov %p2249_p12 }
  0xa1   : > { %s333_s29 = sand.u32 1, %s1930_s27   ;;  %s2150_s18 = scalar_lea.vmem [#allocation8], %s1262_s16 }
  0xa2   : > { %1819 = vsyncadd (%p2250_p7), [#allocation6], 4294965248  ;;  %s334_s10 = scalar_lea.sflag [#allocation9], %s333_s29 }
  0xa3   : > { %1821 = dma.done.wait (%p2248_p4), %s334_s10, 1024  }
  0xa4   : > { %1823 = vsyncadd (%p2248_p4), %s334_s10, 4294966272  ;;  %p2251_p13 = pmov %p2250_p7 }
  0xa5   : > { %p2252_p0 = pmov %p2250_p7 }
  0xa6   : > { %1825 = dma.done.wait (%p2251_p13), [#allocation9], 1024  }
  0xa7   : > { %1827 = vsyncadd (%p2252_p0), [#allocation9], 4294966272  ;;  %p1267_p2 = scmp.ne.s32.totalorder %s1846_s24, 0 }
  0xa8   : > { %v1578_v0 = vld [vmem:[#allocation10] sm:$0xff] (!%p1267_p2)   ;;  %v1579_v1 = vld [vmem:[#allocation10 + $0x8] sm:$0xff] (!%p1267_p2)   ;;  %v1580_v2 = vld [vmem:[#allocation10 + $0x10] sm:$0xff] (!%p1267_p2)  }
  0xa9   : > { %377 = sbr.rel (%p1267_p2) target bundleno = 427 (0x1ab), region = 68  ;;  %1364 = vmatprep.subr.bf16.mxu0 (!%p1267_p2), %v1578_v0  ;;  %1460 = vmatprep.subr.bf16.mxu1 (!%p1267_p2), %v1578_v0  ;;  %v1581_v3 = vld [vmem:[#allocation10 + $0x18] sm:$0xff] (!%p1267_p2)   ;;  %v1586_v4 = vld [vmem:[#allocation5] sm:$0xff] (!%p1267_p2)   ;;  %v1583_v7 = vld [vmem:[#allocation10 + $0x28] sm:$0xff] (!%p1267_p2)  }
  0xaa   : > { %1365 = vmatpush3.bf16.msra.mxu0 (!%p1267_p2), %v1578_v0  ;;  %1468 = vmatpush3.bf16.msra.mxu1 (!%p1267_p2), %v1578_v0  ;;  %v1587_v5 = vld [vmem:[#allocation5 + $0x20] sm:$0xff] (!%p1267_p2)   ;;  %v1584_v8 = vld [vmem:[#allocation10 + $0x30] sm:$0xff] (!%p1267_p2)   ;;  %v1585_v9 = vld [vmem:[#allocation10 + $0x38] sm:$0xff] (!%p1267_p2)  }
  0xab   : > { %1366 = vmatprep.subr.bf16.mxu0 (!%p1267_p2), %v1579_v1  ;;  %1461 = vmatprep.subr.bf16.mxu1 (!%p1267_p2), %v1579_v1  ;;  %v1582_v6 = vld [vmem:[#allocation10 + $0x20] sm:$0xff] (!%p1267_p2)   ;;  %v1588_v10 = vld [vmem:[#allocation5 + $0x8] sm:$0xff] (!%p1267_p2)   ;;  %v1590_v12 = vld [vmem:[#allocation5 + $0x10] sm:$0xff] (!%p1267_p2)  }
  0xac   : > { %1380 = vmatprep.mubr.bf16.mxu0 (!%p1267_p2), %v1586_v4  ;;  %1388 = vmatprep.mubr.bf16.mxu1 (!%p1267_p2), %v1587_v5  ;;  %v1589_v11 = vld [vmem:[#allocation5 + $0x28] sm:$0xff] (!%p1267_p2)   ;;  %v1591_v13 = vld [vmem:[#allocation5 + $0x30] sm:$0xff] (!%p1267_p2)   ;;  %v1592_v14 = vld [vmem:[#allocation5 + $0x18] sm:$0xff] (!%p1267_p2)  }
  0xad   : > { %v1593_v15 = vld [vmem:[#allocation5 + $0x38] sm:$0xff] (!%p1267_p2)   ;;  %v1268_v16 = vld [vmem:[%s2227_s5] ss:$0 sm:$0xff] (!%p1267_p2) }
  0xae   : > { %1367 = vmatpush3.bf16.msra.mxu0 (!%p1267_p2), %v1579_v1  ;;  %1469 = vmatpush3.bf16.msra.mxu1 (!%p1267_p2), %v1579_v1 }
  0xaf   : > { %1368 = vmatprep.subr.bf16.mxu0 (!%p1267_p2), %v1580_v2  ;;  %1462 = vmatprep.subr.bf16.mxu1 (!%p1267_p2), %v1580_v2 }
  0xb2   : > { %1369 = vmatpush3.bf16.msra.mxu0 %v1580_v2  ;;  %1470 = vmatpush3.bf16.msra.mxu1 %v1580_v2 }
  0xb3   : > { %1370 = vmatprep.subr.bf16.mxu0 %v1581_v3  ;;  %1463 = vmatprep.subr.bf16.mxu1 %v1581_v3 }
  0xb6   : > { %1371 = vmatpush3.bf16.msra.mxu0 %v1581_v3  ;;  %1471 = vmatpush3.bf16.msra.mxu1 %v1581_v3 }
  0xb7   : > { %1372 = vmatprep.subr.bf16.mxu0 %v1582_v6  ;;  %1464 = vmatprep.subr.bf16.mxu1 %v1582_v6 }
  0xba   : > { %1373 = vmatpush3.bf16.msra.mxu0 %v1582_v6  ;;  %1472 = vmatpush3.bf16.msra.mxu1 %v1582_v6 }
  0xbb   : > { %1374 = vmatprep.subr.bf16.mxu0 %v1583_v7  ;;  %1465 = vmatprep.subr.bf16.mxu1 %v1583_v7 }
  0xbe   : > { %1375 = vmatpush3.bf16.msra.mxu0 %v1583_v7  ;;  %1473 = vmatpush3.bf16.msra.mxu1 %v1583_v7 }
  0xbf   : > { %1376 = vmatprep.subr.bf16.mxu0 %v1584_v8  ;;  %1466 = vmatprep.subr.bf16.mxu1 %v1584_v8 }
  0xc2   : > { %1377 = vmatpush3.bf16.msra.mxu0 %v1584_v8  ;;  %1474 = vmatpush3.bf16.msra.mxu1 %v1584_v8 }
  0xc3   : > { %1378 = vmatprep.subr.bf16.mxu0 %v1585_v9  ;;  %1467 = vmatprep.subr.bf16.mxu1 %v1585_v9 }
  0xc6   : > { %1379 = vmatpush3.bf16.msra.mxu0 %v1585_v9  ;;  %1475 = vmatpush3.bf16.msra.mxu1 %v1585_v9 }
  0xc9   : > { %1381 = vmatmul.mubr.bf16.vlgmr.msra.gmra.mrb[0].mxu0 %v1588_v10  ;;  %1389 = vmatmul.mubr.bf16.vlgmr.msra.gmra.mrb[0].mxu1 %v1589_v11 }
  0xca   : > { %1384 = vmatprep.mubr.bf16.mxu0 %v1590_v12  ;;  %1392 = vmatprep.mubr.bf16.mxu1 %v1591_v13 }
  0xd1   : > { %1385 = vmatmul.mubr.bf16.gmra.mrb[4].mxu0 %v1592_v14  ;;  %1393 = vmatmul.mubr.bf16.gmra.mrb[4].mxu1 %v1593_v15 }
 0x19c   : > { %v1382_v17 = vpop.f32.mrb[0].mxu0  ;;  %v1390_v18 = vpop.f32.mrb[0].mxu1 }
 0x19d   : > { %v556_v19 = vadd.f32 %v1382_v17, %v1268_v16  ;;  %v588_v20 = vadd.f32 %v1390_v18, %v1268_v16  ;;  %v547_v21 = vpop.f32.mrb[1].mxu0  ;;  %v579_v22 = vpop.f32.mrb[1].mxu1 }
 0x19e   : > { %v548_v23 = vadd.f32 %v1268_v16, %v547_v21  ;;  %v580_v24 = vadd.f32 %v1268_v16, %v579_v22  ;;  %v1383_v25 = vpop.f32.mrb[2].mxu0  ;;  %v1391_v26 = vpop.f32.mrb[2].mxu1 }
 0x19f   : > { %612 = vst [vmem:[#allocation11 + $0x10] sm:$0xff] %v556_v19  ;;  %620 = vst [vmem:[#allocation11 + $0x50] sm:$0xff] %v588_v20  ;;  %v559_v27 = vadd.f32 %v1383_v25, %v1268_v16  ;;  %v591_v28 = vadd.f32 %v1391_v26, %v1268_v16  ;;  %v550_v29 = vpop.f32.mrb[3].mxu0  ;;  %v582_v30 = vpop.f32.mrb[3].mxu1 }
 0x1a0   : > { %610 = vst [vmem:[#allocation11] sm:$0xff] %v548_v23  ;;  %618 = vst [vmem:[#allocation11 + $0x40] sm:$0xff] %v580_v24  ;;  %v551_v31 = vadd.f32 %v1268_v16, %v550_v29  ;;  %v583_v32 = vadd.f32 %v1268_v16, %v582_v30 }
 0x1a1   : > { %613 = vst [vmem:[#allocation11 + $0x18] sm:$0xff] %v559_v27  ;;  %621 = vst [vmem:[#allocation11 + $0x58] sm:$0xff] %v591_v28 }
 0x1a2   : > { %611 = vst [vmem:[#allocation11 + $0x8] sm:$0xff] %v551_v31  ;;  %619 = vst [vmem:[#allocation11 + $0x48] sm:$0xff] %v583_v32 }
 0x1a4   : > { %v1386_v33 = vpop.f32.mrb[4].mxu0  ;;  %v1394_v34 = vpop.f32.mrb[4].mxu1 }
 0x1a5   : > { %v572_v35 = vadd.f32 %v1386_v33, %v1268_v16  ;;  %v604_v36 = vadd.f32 %v1394_v34, %v1268_v16  ;;  %v563_v37 = vpop.f32.mrb[5].mxu0  ;;  %v595_v38 = vpop.f32.mrb[5].mxu1 }
 0x1a6   : > { %v564_v39 = vadd.f32 %v1268_v16, %v563_v37  ;;  %v596_v40 = vadd.f32 %v1268_v16, %v595_v38  ;;  %v1387_v41 = vpop.f32.mrb[6].mxu0  ;;  %v1395_v42 = vpop.f32.mrb[6].mxu1 }
 0x1a7   : > { %616 = vst [vmem:[#allocation11 + $0x30] sm:$0xff] %v572_v35  ;;  %624 = vst [vmem:[#allocation11 + $0x70] sm:$0xff] %v604_v36  ;;  %v575_v43 = vadd.f32 %v1387_v41, %v1268_v16  ;;  %v607_v44 = vadd.f32 %v1395_v42, %v1268_v16  ;;  %v566_v45 = vpop.f32.mrb[7].mxu0  ;;  %v598_v46 = vpop.f32.mrb[7].mxu1 }
 0x1a8   : > { %614 = vst [vmem:[#allocation11 + $0x20] sm:$0xff] %v564_v39  ;;  %622 = vst [vmem:[#allocation11 + $0x60] sm:$0xff] %v596_v40  ;;  %v567_v47 = vadd.f32 %v1268_v16, %v566_v45  ;;  %v599_v48 = vadd.f32 %v1268_v16, %v598_v46 }
 0x1a9   : > { %617 = vst [vmem:[#allocation11 + $0x38] sm:$0xff] %v575_v43  ;;  %625 = vst [vmem:[#allocation11 + $0x78] sm:$0xff] %v607_v44 }
 0x1aa   : > { %615 = vst [vmem:[#allocation11 + $0x28] sm:$0xff] %v567_v47  ;;  %623 = vst [vmem:[#allocation11 + $0x68] sm:$0xff] %v599_v48 }
 0x1ab PF: > { %v1594_v49 = vld [vmem:[#allocation7] sm:$0xff]   ;;  %v1595_v50 = vld [vmem:[#allocation7 + $0x8] sm:$0xff]   ;;  %v1596_v51 = vld [vmem:[#allocation7 + $0x10] sm:$0xff]   ;;  %p1309_p6 = scmp.ne.s32.totalorder %s1846_s24, 5 }
 0x1ac   : > { %1396 = vmatprep.subr.bf16.mxu0 %v1594_v49  ;;  %v1597_v52 = vld [vmem:[#allocation7 + $0x18] sm:$0xff]   ;;  %v1602_v53 = vld [vmem:[%s2139_s9] sm:$0xff]   ;;  %v1599_v55 = vld [vmem:[#allocation7 + $0x28] sm:$0xff]  }
 0x1ad   : > { %1397 = vmatpush3.bf16.msra.mxu0 %v1594_v49  ;;  %1412 = vmatprep.mubr.bf16.mxu0 %v1602_v53  ;;  %v1598_v54 = vld [vmem:[#allocation7 + $0x20] sm:$0xff]   ;;  %v1611_v57 = vld [vmem:[%s2150_s18 + $0x8] sm:$0xff]   ;;  %v1600_v58 = vld [vmem:[#allocation7 + $0x30] sm:$0xff]  }
 0x1ae   : > { %1398 = vmatprep.subr.bf16.mxu0 %v1595_v50  ;;  %v1610_v56 = vld [vmem:[%s2150_s18] sm:$0xff]   ;;  %v1612_v59 = vld [vmem:[%s2150_s18 + $0x10] sm:$0xff]   ;;  %v1601_v60 = vld [vmem:[#allocation7 + $0x38] sm:$0xff]  }
 0x1af   : > { %1428 = vmatprep.subr.bf16.mxu1 %v1610_v56  ;;  %v1613_v61 = vld [vmem:[%s2150_s18 + $0x18] sm:$0xff]   ;;  %v1614_v62 = vld [vmem:[%s2150_s18 + $0x20] sm:$0xff]   ;;  %v1603_v63 = vld [vmem:[%s2139_s9 + $0x8] sm:$0xff]  }
 0x1b0   : > { %1429 = vmatpush3.bf16.msra.mxu1 %v1610_v56  ;;  %v1604_v0 = vld [vmem:[%s2139_s9 + $0x10] sm:$0xff]   ;;  %v1615_v1 = vld [vmem:[%s2150_s18 + $0x28] sm:$0xff]   ;;  %v1605_v3 = vld [vmem:[%s2139_s9 + $0x18] sm:$0xff]  }
 0x1b1   : > { %1399 = vmatpush3.bf16.msra.mxu0 %v1595_v50  ;;  %1430 = vmatprep.subr.bf16.mxu1 %v1611_v57  ;;  %v1616_v2 = vld [vmem:[%s2150_s18 + $0x30] sm:$0xff]   ;;  %v1606_v4 = vld [vmem:[%s2139_s9 + $0x20] sm:$0xff]   ;;  %v1607_v5 = vld [vmem:[%s2139_s9 + $0x28] sm:$0xff]  }
 0x1b2   : > { %1400 = vmatprep.subr.bf16.mxu0 %v1596_v51  ;;  %v1608_v6 = vld [vmem:[%s2139_s9 + $0x30] sm:$0xff]   ;;  %v1609_v7 = vld [vmem:[%s2139_s9 + $0x38] sm:$0xff]   ;;  %v851_v34 = vld [vmem:[#allocation11] sm:$0xff] }
 0x1b3   : > { %v1617_v8 = vld [vmem:[%s2150_s18 + $0x38] sm:$0xff]   ;;  %v853_v33 = vld [vmem:[#allocation11 + $0x10] sm:$0xff]  ;;  %v852_v39 = vld [vmem:[#allocation11 + $0x8] sm:$0xff] }
 0x1b4   : > { %1431 = vmatpush3.bf16.msra.mxu1 %v1611_v57  ;;  %v854_v36 = vld [vmem:[#allocation11 + $0x18] sm:$0xff]  ;;  %v857_v45 = vld [vmem:[#allocation11 + $0x30] sm:$0xff]  ;;  %v855_v46 = vld [vmem:[#allocation11 + $0x20] sm:$0xff] }
 0x1b5   : > { %1401 = vmatpush3.bf16.msra.mxu0 %v1596_v51  ;;  %1432 = vmatprep.subr.bf16.mxu1 %v1612_v59  ;;  %v858_v48 = vld [vmem:[#allocation11 + $0x38] sm:$0xff]  ;;  %v856_v51 = vld [vmem:[#allocation11 + $0x28] sm:$0xff]  ;;  %v861_v57 = vld [vmem:[#allocation11 + $0x50] sm:$0xff] }
 0x1b6   : > { %1402 = vmatprep.subr.bf16.mxu0 %v1597_v52 }
 0x1b8   : > { %1433 = vmatpush3.bf16.msra.mxu1 %v1612_v59 }
 0x1b9   : > { %1403 = vmatpush3.bf16.msra.mxu0 %v1597_v52  ;;  %1434 = vmatprep.subr.bf16.mxu1 %v1613_v61 }
 0x1ba   : > { %1404 = vmatprep.subr.bf16.mxu0 %v1598_v54 }
 0x1bc   : > { %1435 = vmatpush3.bf16.msra.mxu1 %v1613_v61 }
 0x1bd   : > { %1405 = vmatpush3.bf16.msra.mxu0 %v1598_v54  ;;  %1436 = vmatprep.subr.bf16.mxu1 %v1614_v62 }
 0x1be   : > { %1406 = vmatprep.subr.bf16.mxu0 %v1599_v55 }
 0x1c0   : > { %1437 = vmatpush3.bf16.msra.mxu1 %v1614_v62 }
 0x1c1   : > { %1407 = vmatpush3.bf16.msra.mxu0 %v1599_v55  ;;  %1438 = vmatprep.subr.bf16.mxu1 %v1615_v1 }
 0x1c2   : > { %1408 = vmatprep.subr.bf16.mxu0 %v1600_v58 }
 0x1c4   : > { %1439 = vmatpush3.bf16.msra.mxu1 %v1615_v1 }
 0x1c5   : > { %1409 = vmatpush3.bf16.msra.mxu0 %v1600_v58  ;;  %1440 = vmatprep.subr.bf16.mxu1 %v1616_v2  ;;  %v859_v58 = vld [vmem:[#allocation11 + $0x40] sm:$0xff] }
 0x1c6   : > { %1410 = vmatprep.subr.bf16.mxu0 %v1601_v60 }
 0x1c8   : > { %1441 = vmatpush3.bf16.msra.mxu1 %v1616_v2 }
 0x1c9   : > { %1411 = vmatpush3.bf16.msra.mxu0 %v1601_v60  ;;  %1442 = vmatprep.subr.bf16.mxu1 %v1617_v8  ;;  %v862_v60 = vld [vmem:[#allocation11 + $0x58] sm:$0xff] }
 0x1cc   : > { %1413 = vmatmul.mubr.bf16.vlgmr.msra.gmra.mrb[0].mxu0 %v1603_v63  ;;  %1443 = vmatpush3.bf16.msra.mxu1 %v1617_v8  ;;  %v860_v63 = vld [vmem:[#allocation11 + $0x48] sm:$0xff]  ;;  %v866_v8 = vld [vmem:[#allocation11 + $0x78] sm:$0xff] }
 0x1cd   : > { %1416 = vmatprep.mubr.bf16.mxu0 %v1604_v0 }
 0x1d4   : > { %1417 = vmatmul.mubr.bf16.gmra.mrb[4].mxu0 %v1605_v3 }
 0x1d5   : > { %1420 = vmatprep.mubr.bf16.mxu0 %v1606_v4 }
 0x1dc   : > { %1421 = vmatmul.mubr.bf16.gmra.mrb[8].mxu0 %v1607_v5  ;;  %v865_v5 = vld [vmem:[#allocation11 + $0x70] sm:$0xff] }
 0x1dd   : > { %1424 = vmatprep.mubr.bf16.mxu0 %v1608_v6  ;;  %v863_v6 = vld [vmem:[#allocation11 + $0x60] sm:$0xff] }
 0x1e4   : > { %1425 = vmatmul.mubr.bf16.gmra.mrb[12].mxu0 %v1609_v7 }
 0x29f   : > { %v1414_v9 = vpop.f32.mrb[0].mxu0 }
 0x2a0   : > { %v788_v10 = vpop.f32.mrb[1].mxu0 }
 0x2a1   : > { %v1415_v11 = vpop.f32.mrb[2].mxu0 }
 0x2a2   : > { %v868_v12 = vpack.c.bf16 %v1415_v11, %v1414_v9  ;;  %v791_v13 = vpop.f32.mrb[3].mxu0  ;;  %v864_v11 = vld [vmem:[#allocation11 + $0x68] sm:$0xff] }
 0x2a3   : > { %v867_v14 = vpack.c.bf16 %v791_v13, %v788_v10 }
 0x2a5   : > { %1444 = vmatprep.mubr.bf16.mxu1 %v867_v14 }
 0x2a6   : > { %1445 = vmatmul.mubr.bf16.vlgmr.msra.gmra.mrb[0].mxu1 %v868_v12 }
 0x2a7   : > { %v1418_v15 = vpop.f32.mrb[4].mxu0 }
 0x2a8   : > { %v804_v16 = vpop.f32.mrb[5].mxu0 }
 0x2a9   : > { %v1419_v17 = vpop.f32.mrb[6].mxu0 }
 0x2aa   : > { %v870_v18 = vpack.c.bf16 %v1419_v17, %v1418_v15  ;;  %v807_v19 = vpop.f32.mrb[7].mxu0 }
 0x2ab   : > { %v869_v20 = vpack.c.bf16 %v807_v19, %v804_v16 }
 0x2ad   : > { %1448 = vmatprep.mubr.bf16.mxu1 %v869_v20 }
 0x2ae   : > { %1449 = vmatmul.mubr.bf16.gmra.mrb[4].mxu1 %v870_v18 }
 0x2af   : > { %v1422_v21 = vpop.f32.mrb[8].mxu0 }
 0x2b0   : > { %v820_v22 = vpop.f32.mrb[9].mxu0 }
 0x2b1   : > { %v1423_v23 = vpop.f32.mrb[10].mxu0 }
 0x2b2   : > { %v872_v24 = vpack.c.bf16 %v1423_v23, %v1422_v21  ;;  %v823_v25 = vpop.f32.mrb[11].mxu0 }
 0x2b3   : > { %v871_v26 = vpack.c.bf16 %v823_v25, %v820_v22 }
 0x2b5   : > { %1452 = vmatprep.mubr.bf16.mxu1 %v871_v26 }
 0x2b6   : > { %1453 = vmatmul.mubr.bf16.gmra.mrb[8].mxu1 %v872_v24 }
 0x2b7   : > { %v1426_v27 = vpop.f32.mrb[12].mxu0 }
 0x2b8   : > { %v836_v28 = vpop.f32.mrb[13].mxu0 }
 0x2b9   : > { %v1427_v29 = vpop.f32.mrb[14].mxu0 }
 0x2ba   : > { %v874_v30 = vpack.c.bf16 %v1427_v29, %v1426_v27  ;;  %v839_v31 = vpop.f32.mrb[15].mxu0 }
 0x2bb   : > { %v873_v32 = vpack.c.bf16 %v839_v31, %v836_v28 }
 0x2bd   : > { %1456 = vmatprep.mubr.bf16.mxu1 %v873_v32 }
 0x2be   : > { %1457 = vmatmul.mubr.bf16.gmra.mrb[12].mxu1 %v874_v30 }
 0x379   : > { %v1446_v35 = vpop.f32.mrb[0].mxu1 }
 0x37a   : > { %v1038_v37 = vadd.f32 %v1446_v35, %v853_v33  ;;  %v973_v38 = vpop.f32.mrb[1].mxu1 }
 0x37b   : > { %v1036_v40 = vadd.f32 %v973_v38, %v851_v34  ;;  %v1447_v41 = vpop.f32.mrb[2].mxu1 }
 0x37c   : > { %1054 = vst [vmem:[#allocation11 + $0x10] sm:$0xff] %v1038_v37  ;;  %v1039_v42 = vadd.f32 %v1447_v41, %v854_v36  ;;  %v976_v43 = vpop.f32.mrb[3].mxu1 }
 0x37d   : > { %1052 = vst [vmem:[#allocation11] sm:$0xff] %v1036_v40  ;;  %v1037_v44 = vadd.f32 %v976_v43, %v852_v39 }
 0x37e   : > { %1055 = vst [vmem:[#allocation11 + $0x18] sm:$0xff] %v1039_v42 }
 0x37f   : > { %1053 = vst [vmem:[#allocation11 + $0x8] sm:$0xff] %v1037_v44 }
 0x381   : > { %v1450_v47 = vpop.f32.mrb[4].mxu1 }
 0x382   : > { %v1042_v49 = vadd.f32 %v1450_v47, %v857_v45  ;;  %v989_v50 = vpop.f32.mrb[5].mxu1 }
 0x383   : > { %v1040_v52 = vadd.f32 %v989_v50, %v855_v46  ;;  %v1451_v53 = vpop.f32.mrb[6].mxu1  ;;  %v1074_v19 = vld [vmem:[#allocation11 + $0x10] sm:$0xff] (!%p1309_p6) }
 0x384   : > { %1058 = vst [vmem:[#allocation11 + $0x30] sm:$0xff] %v1042_v49  ;;  %v1043_v54 = vadd.f32 %v1451_v53, %v858_v48  ;;  %v992_v55 = vpop.f32.mrb[7].mxu1  ;;  %v1072_v17 = vld [vmem:[#allocation11] sm:$0xff] (!%p1309_p6)  ;;  %v1090_v22 = vmax.f32 (!%p1309_p6), %v1074_v19, 0.0 }
 0x385   : > { %1056 = vst [vmem:[#allocation11 + $0x20] sm:$0xff] %v1040_v52  ;;  %v1041_v56 = vadd.f32 %v992_v55, %v856_v51  ;;  %v1088_v20 = vmax.f32 (!%p1309_p6), %v1072_v17, 0.0  ;;  %v1075_v23 = vld [vmem:[#allocation11 + $0x18] sm:$0xff] (!%p1309_p6) }
 0x386   : > { %1059 = vst [vmem:[#allocation11 + $0x38] sm:$0xff] %v1043_v54  ;;  %v1073_v18 = vld [vmem:[#allocation11 + $0x8] sm:$0xff] (!%p1309_p6)  ;;  %v1091_v26 = vmax.f32 (!%p1309_p6), %v1075_v23, 0.0  ;;  %1106 = vst [vmem:[#allocation11 + $0x10] sm:$0xff] (!%p1309_p6), %v1090_v22 }
 0x387   : > { %1057 = vst [vmem:[#allocation11 + $0x28] sm:$0xff] %v1041_v56  ;;  %v1089_v21 = vmax.f32 (!%p1309_p6), %v1073_v18, 0.0  ;;  %1104 = vst [vmem:[#allocation11] sm:$0xff] (!%p1309_p6), %v1088_v20 }
 0x388   : > { %1107 = vst [vmem:[#allocation11 + $0x18] sm:$0xff] (!%p1309_p6), %v1091_v26 }
 0x389   : > { %v1454_v59 = vpop.f32.mrb[8].mxu1  ;;  %1105 = vst [vmem:[#allocation11 + $0x8] sm:$0xff] (!%p1309_p6), %v1089_v21 }
 0x38a   : > { %v1046_v61 = vadd.f32 %v1454_v59, %v861_v57  ;;  %v1005_v62 = vpop.f32.mrb[9].mxu1 }
 0x38b   : > { %v1044_v0 = vadd.f32 %v1005_v62, %v859_v58  ;;  %v1455_v1 = vpop.f32.mrb[10].mxu1  ;;  %v1078_v29 = vld [vmem:[#allocation11 + $0x30] sm:$0xff] (!%p1309_p6) }
 0x38c   : > { %1062 = vst [vmem:[#allocation11 + $0x50] sm:$0xff] %v1046_v61  ;;  %v1047_v2 = vadd.f32 %v1455_v1, %v862_v60  ;;  %v1008_v3 = vpop.f32.mrb[11].mxu1  ;;  %v1076_v24 = vld [vmem:[#allocation11 + $0x20] sm:$0xff] (!%p1309_p6)  ;;  %v1094_v32 = vmax.f32 (!%p1309_p6), %v1078_v29, 0.0 }
 0x38d   : > { %1060 = vst [vmem:[#allocation11 + $0x40] sm:$0xff] %v1044_v0  ;;  %v1045_v4 = vadd.f32 %v1008_v3, %v860_v63  ;;  %v1092_v27 = vmax.f32 (!%p1309_p6), %v1076_v24, 0.0  ;;  %v1079_v30 = vld [vmem:[#allocation11 + $0x38] sm:$0xff] (!%p1309_p6) }
 0x38e   : > { %1063 = vst [vmem:[#allocation11 + $0x58] sm:$0xff] %v1047_v2  ;;  %v1077_v25 = vld [vmem:[#allocation11 + $0x28] sm:$0xff] (!%p1309_p6)  ;;  %v1095_v33 = vmax.f32 (!%p1309_p6), %v1079_v30, 0.0  ;;  %1110 = vst [vmem:[#allocation11 + $0x30] sm:$0xff] (!%p1309_p6), %v1094_v32 }
 0x38f   : > { %1061 = vst [vmem:[#allocation11 + $0x48] sm:$0xff] %v1045_v4  ;;  %v1093_v28 = vmax.f32 (!%p1309_p6), %v1077_v25, 0.0  ;;  %1108 = vst [vmem:[#allocation11 + $0x20] sm:$0xff] (!%p1309_p6), %v1092_v27 }
 0x390   : > { %1111 = vst [vmem:[#allocation11 + $0x38] sm:$0xff] (!%p1309_p6), %v1095_v33 }
 0x391   : > { %v1458_v7 = vpop.f32.mrb[12].mxu1  ;;  %1071 = sbr.rel (%p1309_p6) target bundleno = 930 (0x3a2), region = 72  ;;  %1109 = vst [vmem:[#allocation11 + $0x28] sm:$0xff] (!%p1309_p6), %v1093_v28 }
 0x392   : > { %v1050_v9 = vadd.f32 %v1458_v7, %v865_v5  ;;  %v1021_v10 = vpop.f32.mrb[13].mxu1 }
 0x393   : > { %v1048_v12 = vadd.f32 %v1021_v10, %v863_v6  ;;  %v1459_v13 = vpop.f32.mrb[14].mxu1  ;;  %v1082_v36 = vld [vmem:[#allocation11 + $0x50] sm:$0xff] (!%p1309_p6) }
 0x394   : > { %1066 = vst [vmem:[#allocation11 + $0x70] sm:$0xff] %v1050_v9  ;;  %v1051_v14 = vadd.f32 %v1459_v13, %v866_v8  ;;  %v1024_v15 = vpop.f32.mrb[15].mxu1  ;;  %v1080_v31 = vld [vmem:[#allocation11 + $0x40] sm:$0xff] (!%p1309_p6)  ;;  %v1098_v39 = vmax.f32 (!%p1309_p6), %v1082_v36, 0.0 }
 0x395   : > { %1064 = vst [vmem:[#allocation11 + $0x60] sm:$0xff] %v1048_v12  ;;  %v1049_v16 = vadd.f32 %v1024_v15, %v864_v11  ;;  %v1096_v34 = vmax.f32 (!%p1309_p6), %v1080_v31, 0.0  ;;  %v1083_v37 = vld [vmem:[#allocation11 + $0x58] sm:$0xff] (!%p1309_p6) }
 0x396   : > { %1067 = vst [vmem:[#allocation11 + $0x78] sm:$0xff] %v1051_v14  ;;  %v1081_v35 = vld [vmem:[#allocation11 + $0x48] sm:$0xff] (!%p1309_p6)  ;;  %v1099_v40 = vmax.f32 (!%p1309_p6), %v1083_v37, 0.0  ;;  %1114 = vst [vmem:[#allocation11 + $0x50] sm:$0xff] (!%p1309_p6), %v1098_v39 }
 0x397   : > { %1065 = vst [vmem:[#allocation11 + $0x68] sm:$0xff] %v1049_v16  ;;  %v1097_v38 = vmax.f32 (!%p1309_p6), %v1081_v35, 0.0  ;;  %1112 = vst [vmem:[#allocation11 + $0x40] sm:$0xff] (!%p1309_p6), %v1096_v34 }
 0x398   : > { %1115 = vst [vmem:[#allocation11 + $0x58] sm:$0xff] %v1099_v40 }
 0x399   : > { %1113 = vst [vmem:[#allocation11 + $0x48] sm:$0xff] %v1097_v38 }
 0x39b   : > { %v1086_v43 = vld [vmem:[#allocation11 + $0x70] sm:$0xff] }
 0x39c   : > { %v1084_v41 = vld [vmem:[#allocation11 + $0x60] sm:$0xff]  ;;  %v1102_v46 = vmax.f32 %v1086_v43, 0.0 }
 0x39d   : > { %v1100_v44 = vmax.f32 %v1084_v41, 0.0  ;;  %v1087_v47 = vld [vmem:[#allocation11 + $0x78] sm:$0xff] }
 0x39e   : > { %v1085_v42 = vld [vmem:[#allocation11 + $0x68] sm:$0xff]  ;;  %v1103_v48 = vmax.f32 %v1087_v47, 0.0  ;;  %1118 = vst [vmem:[#allocation11 + $0x70] sm:$0xff] %v1102_v46 }
 0x39f   : > { %v1101_v45 = vmax.f32 %v1085_v42, 0.0  ;;  %1116 = vst [vmem:[#allocation11 + $0x60] sm:$0xff] %v1100_v44 }
 0x3a0   : > { %1119 = vst [vmem:[#allocation11 + $0x78] sm:$0xff] %v1103_v48 }
 0x3a1   : > { %1117 = vst [vmem:[#allocation11 + $0x68] sm:$0xff] %v1101_v45 }
 0x3a2 PF: > { %p1520_p10 = scmp.eq.s32.totalorder %s1930_s27, 5  ;;  %s1863_s24 = smov [#allocation11]  }
 0x3a3   : > { %s1129_s30 = sshll.u32 %s1863_s24, 4  ;;  %s1130_s30 = int_to_ptr.vmem [resolvable:$true] %s1129_s30 }
 0x3a4   : > { %s1762_s17 = scalar_lea.vmem %s1130_s30, 2048  ;;  %p1769_p5 = scmp.lt.s32.totalorder %s1130_s30, %s1130_s30 }
 0x3a5   : > { %p1763_p1 = scmp.ne.s32.totalorder %s1130_s30, %s1762_s17  ;;  %p1770_p9 = scmp.lt.s32.totalorder %s1762_s17, %s1762_s17 }
 0x3a7   : > { %p1764_p8 = pnand %p1763_p1, %p1520_p10  ;;  %p1771_p3 = por %p1770_p9, %p1769_p5 }
 0x3a9   : > { %p1765_p11 = pneg %p1764_p8 }
 0x3ab   : > { %p1772_p4 = pnand %p1771_p3, %p1765_p11 }
 0x3ad   : > { %1775 = shalt.err (!%p1772_p4)
}
 0x3ae   : > { %s1776_s1 = scalar_lea.hbm %s2228_s6, 2048 }
 0x3af   : > { %p1777_p12 = scmp.ne.s32.totalorder %s2228_s6, %s1776_s1  ;;  %p1782_p0 = scmp.lt.u32.totalorder %s1776_s1, %s2228_s6 }
 0x3b1   : > { %p1778_p7 = pnand %p1777_p12, %p1520_p10 }
 0x3b3   : > { %p1779_p13 = pneg %p1778_p7 }
 0x3b5   : > { %p1784_p2 = pnand %p1782_p0, %p1779_p13 }
 0x3b7   : > { %1787 = shalt.err (!%p1784_p2)
}
 0x3b8   : > { %s1864_s11 = smov 128   ;;  %s1865_s16 = smov 8  }
 0x3b9   : > { %1493 = dma.vmem_to_hbm [thread:$0]  (%p1520_p10), %s1130_s30, 2048, %s2228_s6, [#allocation4], %s1864_s11, %s1864_s11, %s1865_s16  }
 0x3ba   : > { %1829 = dma.done.wait (%p1520_p10), [#allocation4], 2048  }
 0x3bb   : > { %1831 = vsyncadd (%p1520_p10), [#allocation4], 4294965248 }
 0x3bc PF: > { %s24_s26 = sadd.s32 1, %s1854_s26   ;;  %s2253_s21 = smov %s1838_s22 }
 0x3bd   : > { %p21_p6 = scmp.ge.s32.totalorder %s24_s26, 8   ;;  %s2254_s22 = smov %s1842_s23 }
 0x3be   : > { %s2255_s23 = smov %s2053_s12  ;;  %s2256_s24 = smov %s1850_s25 }
 0x3bf   : > { %s2257_s25 = smov %s2259_s13  ;;  %23 = sbr.rel (!%p21_p6) target bundleno = 11 (0xb), region = 116 }
 0x3c6   :  { %1145 = vsyncpa [#allocation3], 1 }
 0x3c7   :  { %1147 = vsyncpa [#allocation3 + $0x1], 1 }
 0x3c8   :  { %1148 = vsyncpa [#allocation6], 1 }
 0x3c9   :  { %1149 = vsyncpa [#allocation9], 1 }
 0x3ca   :  { %1151 = vsyncpa [#allocation9 + $0x1], 1 }
 0x3cb   :  { %1152 = vsyncpa [#allocation4], 1 }
 0x3cc   :  { %1154 = vsyncpa [#allocation4 + $0x1], 1 }

</bundles_post_ra>
